<compile_context>
chip_gen: v6e
topology: v6e:2x2x1
jax: 0.10.0
libtpu: 0.0.40
codegen_flags: <defaults>
</compile_context>

<pallas_src>
import jax
import jax.numpy as jnp
from jax.experimental import pallas as pl
from jax.experimental.pallas import tpu as pltpu


def _sep_net_kernel(tx_ref, wt_ref, bt_ref, px_ref, wp_ref, bp_ref,
                    ot_ref, op_ref):
    # Two independent MXU matmuls with f32 accumulation + two VPU bias adds.
    ot_ref[...] = (
        jnp.dot(tx_ref[...], wt_ref[...], preferred_element_type=jnp.float32)
        + bt_ref[...]
    ).astype(ot_ref.dtype)
    op_ref[...] = (
        jnp.dot(px_ref[...], wp_ref[...], preferred_element_type=jnp.float32)
        + bp_ref[...]
    ).astype(op_ref.dtype)


def separate_network_forward(trans_output, pred_output,
                             w_trans, b_trans, w_pred, b_pred):
    """Pallas implementation of Separate_network.forward (dropout_ratio=0.0).

    trans_output: [B, trans_size] f32
    pred_output:  [B, pred_size]  f32
    w_trans:      [trans_size, target] f32  (transposed vs torch [out, in])
    b_trans:      [target] f32
    w_pred:       [pred_size, target] f32
    b_pred:       [target] f32
    returns (trans_project, pred_project), each [B, target] f32
    """
    B, trans_size = trans_output.shape
    pred_size = pred_output.shape[1]
    target = w_trans.shape[1]

    # Biases as 2D rows so they broadcast over the row block inside the kernel.
    bt2 = b_trans.reshape(1, target).astype(jnp.float32)
    bp2 = b_pred.reshape(1, target).astype(jnp.float32)

    # Row tiling: a single full-array block for small B (block_shape == array
    # dims satisfies the (8,128) rule); >=512-row blocks when B scales so the
    # per-step overhead amortizes and rows can shard across v7x's 2 TCs.
    if B <= 512:
        bm = B
    else:
        bm = 512  # divisible by 8; feature dims equal full extents.
    grid = (pl.cdiv(B, bm),)

    row_spec = lambda cols: pl.BlockSpec((bm, cols), lambda i: (i, 0))
    resident = lambda shape: pl.BlockSpec(shape, lambda i: (0,) * len(shape))

    cost = pl.CostEstimate(
        flops=2 * B * (trans_size + pred_size) * target,
        transcendentals=0,
        bytes_accessed=4 * (B * (trans_size + pred_size)
                            + (trans_size + pred_size) * target
                            + 2 * target
                            + 2 * B * target),
    )

    trans_proj, pred_proj = pl.pallas_call(
        _sep_net_kernel,
        out_shape=(
            jax.ShapeDtypeStruct((B, target), jnp.float32),
            jax.ShapeDtypeStruct((B, target), jnp.float32),
        ),
        grid=grid,
        in_specs=[
            row_spec(trans_size),            # trans_output rows
            resident(w_trans.shape),         # W_t resident across grid
            resident((1, target)),           # b_t resident
            row_spec(pred_size),             # pred_output rows
            resident(w_pred.shape),          # W_p resident
            resident((1, target)),           # b_p resident
        ],
        out_specs=(
            row_spec(target),
            row_spec(target),
        ),
        cost_estimate=cost,
        compiler_params=pltpu.CompilerParams(
            dimension_semantics=("parallel",)),
    )(trans_output, w_trans, bt2, pred_output, w_pred, bp2)

    return trans_proj, pred_proj


if __name__ == "__main__":
    # Module config (small, consistent with the forward semantics):
    batch = 2
    trans_size = 32
    pred_size = 48
    target_size = 16
    # dropout_ratio = 0.0 -> nn.Dropout is None -> dropout path is identity.
    # TODO(synk): training-mode dropout not implemented; ratio=0.0 makes it identity.

    key = jax.random.PRNGKey(0)
    k1, k2, k3, k4, k5, k6 = jax.random.split(key, 6)

    trans_output = jax.random.normal(k1, (batch, trans_size), dtype=jnp.float32)
    pred_output = jax.random.normal(k2, (batch, pred_size), dtype=jnp.float32)

    # Deterministic parameter init mimicking nn.Linear uniform(-1/sqrt(in), 1/sqrt(in)).
    bt_bound = 1.0 / jnp.sqrt(jnp.float32(trans_size))
    bp_bound = 1.0 / jnp.sqrt(jnp.float32(pred_size))
    w_trans = jax.random.uniform(k3, (trans_size, target_size),
                                 minval=-bt_bound, maxval=bt_bound,
                                 dtype=jnp.float32)
    b_trans = jax.random.uniform(k4, (target_size,),
                                 minval=-bt_bound, maxval=bt_bound,
                                 dtype=jnp.float32)
    w_pred = jax.random.uniform(k5, (pred_size, target_size),
                                minval=-bp_bound, maxval=bp_bound,
                                dtype=jnp.float32)
    b_pred = jax.random.uniform(k6, (target_size,),
                                minval=-bp_bound, maxval=bp_bound,
                                dtype=jnp.float32)

    trans_proj, pred_proj = separate_network_forward(
        trans_output, pred_output, w_trans, b_trans, w_pred, b_pred)
    jax.block_until_ready((trans_proj, pred_proj))

    # Reference check in plain JAX against the original (unfused) math.
    ref_t = trans_output @ w_trans + b_trans
    ref_p = pred_output @ w_pred + b_pred
    assert trans_proj.shape == (batch, target_size)
    assert pred_proj.shape == (batch, target_size)
    assert jnp.allclose(trans_proj, ref_t, atol=1e-5)
    assert jnp.allclose(pred_proj, ref_p, atol=1e-5)

    print("KERNEL_OK")
</pallas_src>

<mosaic_0001>
module attributes {stable_mosaic.version = 11 : i64} {
  func.func @_sep_net_kernel(%arg0: i32, %arg1: memref<2x32xf32, #tpu.memory_space<vmem>>, %arg2: memref<32x16xf32, #tpu.memory_space<vmem>>, %arg3: memref<1x16xf32, #tpu.memory_space<vmem>>, %arg4: memref<2x48xf32, #tpu.memory_space<vmem>>, %arg5: memref<48x16xf32, #tpu.memory_space<vmem>>, %arg6: memref<1x16xf32, #tpu.memory_space<vmem>>, %arg7: memref<2x16xf32, #tpu.memory_space<vmem>>, %arg8: memref<2x16xf32, #tpu.memory_space<vmem>>) attributes {dimension_semantics = [#tpu.dimension_semantics<parallel>], iteration_bounds = array<i64: 1>, scalar_prefetch = 0 : i64, scratch_operands = 0 : i64, tpu.core_type = #tpu.core_type<tc>, window_params = [{transform_indices = @transform_0, window_bounds = array<i64: 2, 32>}, {pipeline_mode = #tpu.pipeline_mode<synchronous>, transform_indices = @transform_1, window_bounds = array<i64: 32, 16>}, {pipeline_mode = #tpu.pipeline_mode<synchronous>, transform_indices = @transform_2, window_bounds = array<i64: 1, 16>}, {transform_indices = @transform_3, window_bounds = array<i64: 2, 48>}, {pipeline_mode = #tpu.pipeline_mode<synchronous>, transform_indices = @transform_4, window_bounds = array<i64: 48, 16>}, {pipeline_mode = #tpu.pipeline_mode<synchronous>, transform_indices = @transform_5, window_bounds = array<i64: 1, 16>}, {transform_indices = @transform_6, window_bounds = array<i64: 2, 16>}, {transform_indices = @transform_7, window_bounds = array<i64: 2, 16>}]} {
    %c0 = arith.constant 0 : index
    %c0_0 = arith.constant 0 : index
    %0 = vector.load %arg1[%c0, %c0_0] : memref<2x32xf32, #tpu.memory_space<vmem>>, vector<2x32xf32>
    %c0_1 = arith.constant 0 : index
    %c0_2 = arith.constant 0 : index
    %1 = vector.load %arg2[%c0_1, %c0_2] : memref<32x16xf32, #tpu.memory_space<vmem>>, vector<32x16xf32>
    %cst = arith.constant dense<0.000000e+00> : vector<2x16xf32>
    %2 = tpu.matmul %0, %1, %cst {dimension_numbers = #tpu.dot_dimension_numbers<[1], [0], [0], [1], [0, 0, 1, 1], [], []>} : vector<2x32xf32>, vector<32x16xf32>, vector<2x16xf32> -> vector<2x16xf32>
    %c0_3 = arith.constant 0 : index
    %c0_4 = arith.constant 0 : index
    %3 = vector.load %arg3[%c0_3, %c0_4] : memref<1x16xf32, #tpu.memory_space<vmem>>, vector<1x16xf32>
    %4 = vector.broadcast %3 : vector<1x16xf32> to vector<2x16xf32>
    %5 = arith.addf %2, %4 : vector<2x16xf32>
    %c0_5 = arith.constant 0 : index
    %c0_6 = arith.constant 0 : index
    %6 = vector.load %arg7[%c0_5, %c0_6] : memref<2x16xf32, #tpu.memory_space<vmem>>, vector<2x16xf32>
    tpu.vector_store %arg7[%c0_5, %c0_6], %5 {strides = array<i32>} : memref<2x16xf32, #tpu.memory_space<vmem>>, vector<2x16xf32>,
    %c0_7 = arith.constant 0 : index
    %c0_8 = arith.constant 0 : index
    %7 = vector.load %arg4[%c0_7, %c0_8] : memref<2x48xf32, #tpu.memory_space<vmem>>, vector<2x48xf32>
    %c0_9 = arith.constant 0 : index
    %c0_10 = arith.constant 0 : index
    %8 = vector.load %arg5[%c0_9, %c0_10] : memref<48x16xf32, #tpu.memory_space<vmem>>, vector<48x16xf32>
    %cst_11 = arith.constant dense<0.000000e+00> : vector<2x16xf32>
    %9 = tpu.matmul %7, %8, %cst_11 {dimension_numbers = #tpu.dot_dimension_numbers<[1], [0], [0], [1], [0, 0, 1, 1], [], []>} : vector<2x48xf32>, vector<48x16xf32>, vector<2x16xf32> -> vector<2x16xf32>
    %c0_12 = arith.constant 0 : index
    %c0_13 = arith.constant 0 : index
    %10 = vector.load %arg6[%c0_12, %c0_13] : memref<1x16xf32, #tpu.memory_space<vmem>>, vector<1x16xf32>
    %11 = vector.broadcast %10 : vector<1x16xf32> to vector<2x16xf32>
    %12 = arith.addf %9, %11 : vector<2x16xf32>
    %c0_14 = arith.constant 0 : index
    %c0_15 = arith.constant 0 : index
    %13 = vector.load %arg8[%c0_14, %c0_15] : memref<2x16xf32, #tpu.memory_space<vmem>>, vector<2x16xf32>
    tpu.vector_store %arg8[%c0_14, %c0_15], %12 {strides = array<i32>} : memref<2x16xf32, #tpu.memory_space<vmem>>, vector<2x16xf32>,
    return
  }
  func.func @transform_0(%arg0: i32) -> (i32, i32) {
    %c0_i32 = arith.constant 0 : i32
    %c0_i32_0 = arith.constant 0 : i32
    return %arg0, %c0_i32 : i32, i32
  }
  func.func @transform_1(%arg0: i32) -> (i32, i32) {
    %c0_i32 = arith.constant 0 : i32
    %c0_i32_0 = arith.constant 0 : i32
    %c0_i32_1 = arith.constant 0 : i32
    return %c0_i32, %c0_i32_0 : i32, i32
  }
  func.func @transform_2(%arg0: i32) -> (i32, i32) {
    %c0_i32 = arith.constant 0 : i32
    %c0_i32_0 = arith.constant 0 : i32
    %c0_i32_1 = arith.constant 0 : i32
    return %c0_i32, %c0_i32_0 : i32, i32
  }
  func.func @transform_3(%arg0: i32) -> (i32, i32) {
    %c0_i32 = arith.constant 0 : i32
    %c0_i32_0 = arith.constant 0 : i32
    return %arg0, %c0_i32 : i32, i32
  }
  func.func @transform_4(%arg0: i32) -> (i32, i32) {
    %c0_i32 = arith.constant 0 : i32
    %c0_i32_0 = arith.constant 0 : i32
    %c0_i32_1 = arith.constant 0 : i32
    return %c0_i32, %c0_i32_0 : i32, i32
  }
  func.func @transform_5(%arg0: i32) -> (i32, i32) {
    %c0_i32 = arith.constant 0 : i32
    %c0_i32_0 = arith.constant 0 : i32
    %c0_i32_1 = arith.constant 0 : i32
    return %c0_i32, %c0_i32_0 : i32, i32
  }
  func.func @transform_6(%arg0: i32) -> (i32, i32) {
    %c0_i32 = arith.constant 0 : i32
    %c0_i32_0 = arith.constant 0 : i32
    return %arg0, %c0_i32 : i32, i32
  }
  func.func @transform_7(%arg0: i32) -> (i32, i32) {
    %c0_i32 = arith.constant 0 : i32
    %c0_i32_0 = arith.constant 0 : i32
    return %arg0, %c0_i32 : i32, i32
  }
}

</mosaic_0001>

<bundles_post_ra>
// kernel: tpu_custom_call.1
= control target key start
LH: loop header
LB: loop body
LE: loop exit
PB: predicated region body
PF: predicated region fallthrough
CT: control target
= control target key end

     0   :  { %13 = vsyncpa [#allocation3], 0  ;;  %v322_v2 = vmov 0.0   ;;  %s416_s0 = inlined_call_operand.vmem [shape: f32[2,32], index: 0, kind: input, shape index: {}]   ;;  %s417_s1 = inlined_call_operand.vmem [shape: f32[32,16], index: 1, kind: input, shape index: {}]   ;;  %s418_s2 = inlined_call_operand.vmem [shape: f32[1,16], index: 2, kind: input, shape index: {}]   ;;  %s419_s3 = inlined_call_operand.vmem [shape: f32[2,48], index: 3, kind: input, shape index: {}]   ;;  %s420_s4 = inlined_call_operand.vmem [shape: f32[48,16], index: 4, kind: input, shape index: {}]   ;;  %s421_s5 = inlined_call_operand.vmem [shape: f32[1,16], index: 5, kind: input, shape index: {}]   ;;  %s422_s6 = inlined_call_operand.hbm [shape: f32[2,16], index: 6, kind: output, shape index: {0}]   ;;  %s423_s7 = inlined_call_operand.hbm [shape: f32[2,16], index: 7, kind: output, shape index: {1}]  }
   0x1   :  { %v121_v0 = vld [vmem:[%s420_s4 + $0x28] sm:$0xff]  ;;  %v31_v1 = vld [vmem:[%s417_s1 + $0x18] sm:$0xff]  ;;  %259 = vmatprep.subr.mxu1 %v322_v2  ;;  %248 = vmatprep.subr.mxu0 %v322_v2  ;;  %v120_v3 = vld [vmem:[%s420_s4 + $0x20] sm:$0xff] }
   0x2   :  { %v30_v4 = vld [vmem:[%s417_s1 + $0x10] sm:$0xff]  ;;  %260 = vmatpush3.msra.mxu1 %v121_v0  ;;  %249 = vmatpush3.msra.mxu0 %v31_v1  ;;  %v119_v5 = vld [vmem:[%s420_s4 + $0x18] sm:$0xff]  ;;  %v29_v6 = vld [vmem:[%s417_s1 + $0x8] sm:$0xff] }
   0x3   :  { %261 = vmatprep.subr.mxu1 %v322_v2  ;;  %250 = vmatprep.subr.mxu0 %v322_v2 }
   0x4   :  { %262 = vmatpush3.msra.mxu1 %v120_v3  ;;  %251 = vmatpush3.msra.mxu0 %v30_v4 }
   0x5   :  { %14 = vsyncpa [#allocation5], 0  ;;  %263 = vmatprep.subr.mxu1 %v322_v2  ;;  %252 = vmatprep.subr.mxu0 %v322_v2  ;;  %v118_v7 = vld [vmem:[%s420_s4 + $0x10] sm:$0xff]  ;;  %v28_v8 = vld [vmem:[%s417_s1] sm:$0xff]  ;;  %vm39_vm0 = vcmask 261120   ;;  %vm323_vm1 = vmmov 0  }
   0x6   :  { %264 = vmatpush3.msra.mxu1 %v119_v5  ;;  %253 = vmatpush3.msra.mxu0 %v29_v6  ;;  %v117_v9 = vld [vmem:[%s420_s4 + $0x8] sm:$0xff]  ;;  %v27_v10 = vld [vmem:[%s416_s0] sm:$0x3]  ;;  %vm129_vm2 = vcmask 392192   ;;  %s324_s25 = smov [#allocation2]   ;;  %vm113_vm3 = vcmask 123904  }
   0x7   :  { %265 = vmatprep.subr.mxu1 %v322_v2  ;;  %254 = vmatprep.subr.mxu0 %v322_v2  ;;  %v116_v11 = vld [vmem:[%s420_s4] sm:$0xff]  ;;  %s210_s26 = sshll.u32 %s324_s25, 4  ;;  %s325_s4 = smov [#allocation4]   ;;  %s211_s26 = int_to_ptr.vmem [resolvable:$true] %s210_s26 }
   0x8   :  { %266 = vmatpush3.msra.mxu1 %v118_v7  ;;  %255 = vmatpush3.msra.mxu0 %v28_v8  ;;  %v115_v12 = vld [vmem:[%s419_s3] sm:$0x3]  ;;  %s220_s27 = sshll.u32 %s325_s4, 4  ;;  %s278_s3 = scalar_lea.vmem %s211_s26, 32  ;;  %s221_s27 = int_to_ptr.vmem [resolvable:$true] %s220_s27 }
   0x9   :  { %267 = vmatprep.subr.mxu1 %v322_v2  ;;  %256 = vmatprep.mubr.msk.f32.mxu0 %vm323_vm1, %v322_v2  ;;  %v232_v13 = vld [vmem:[%s418_s2] ss:$0 sm:$0xff]  ;;  %p279_p0 = scmp.ne.s32.totalorder %s211_s26, %s278_s3  ;;  %p283_p1 = scmp.lt.s32.totalorder %s211_s26, %s211_s26 }
   0xa   :  { %268 = vmatpush3.msra.mxu1 %v117_v9  ;;  %257 = vmatmul.mubr.msk.f32.vlgmr.msra.gmra.mxu0 %vm39_vm0, %v27_v10  ;;  %v234_v16 = vld [vmem:[%s421_s5] ss:$0 sm:$0xff]  ;;  %p284_p2 = scmp.lt.s32.totalorder %s278_s3, %s278_s3 }
   0xb   :  { %269 = vmatprep.subr.mxu1 %v322_v2  ;;  %271 = vmatprep.mubr.msk.f32.mxu1 %vm323_vm1, %v322_v2 }
   0xc   :  { %270 = vmatpush3.msra.mxu1 %v116_v11  ;;  %p285_p3 = por %p284_p2, %p283_p1 }
   0xd   :  { %272 = vmatmul.mubr.msk.f32.vlgmr.msra.gmra.mxu1 %vm129_vm2, %v115_v12 }
   0xe   :  { %p286_p4 = pnand %p285_p3, %p279_p0 }
  0xca   :  { %v109_v14 = vpop.f32.mrf.mxu0 }
  0xcb   :  { %v110_v15 = vadd.f32 %v232_v13, %v109_v14 }
  0xcc   :  { %v258_v17 = vpop.f32.mrf.mxu0 }
  0xcd   :  { %v199_v18 = vpop.f32.mrf.mxu1  ;;  %114 = vst.msk [vmem:[#allocation2] sm:$0x3] %vm113_vm3, %v110_v15 }
  0xce   :  { %v200_v19 = vadd.f32 %v234_v16, %v199_v18 }
  0xcf   :  { %289 = shalt.err (!%p286_p4)
}
  0xd0   :  { %213 = dma.vmem_to_hbm [thread:$0]  %s211_s26, 32, %s422_s6, [#allocation3]   ;;  %v273_v20 = vpop.f32.mrf.mxu1  ;;  %203 = vst.msk [vmem:[#allocation4] sm:$0x3] %vm113_vm3, %v200_v19 }
  0xd1   :  { %s298_s5 = scalar_lea.vmem %s221_s27, 32  ;;  %p303_p6 = scmp.lt.s32.totalorder %s221_s27, %s221_s27 }
  0xd2   :  { %p299_p5 = scmp.ne.s32.totalorder %s221_s27, %s298_s5  ;;  %p304_p7 = scmp.lt.s32.totalorder %s298_s5, %s298_s5 }
  0xd4   :  { %p305_p8 = por %p304_p7, %p303_p6 }
  0xd6   :  { %p306_p9 = pnand %p305_p8, %p299_p5 }
  0xd8   :  { %309 = shalt.err (!%p306_p9)
}
  0xd9   :  { %223 = dma.vmem_to_hbm [thread:$0]  %s221_s27, 32, %s423_s7, [#allocation5]  }
  0xda   :  { %318 = dma.done.wait [#allocation3], 32  }
  0xdb   :  { %319 = vsyncadd [#allocation3], 4294967264 }
  0xdc   :  { %320 = dma.done.wait [#allocation5], 32  }
  0xdd   :  { %321 = vsyncadd [#allocation5], 4294967264 }
  0xde   :  { %230 = vsyncpa [#allocation3], 1 }
  0xdf   :  { %231 = vsyncpa [#allocation5], 1 }

</bundles_post_ra>
